<compile_context>
chip_gen: v6e
topology: v6e:2x2x1
jax: 0.10.0
libtpu: 0.0.40
codegen_flags: <defaults>
</compile_context>

<pallas_src>
import functools

import jax
import jax.numpy as jnp
from jax.experimental import pallas as pl
from jax.experimental.pallas import tpu as pltpu

LANE = 128


def _round_up(n, m):
    return ((n + m - 1) // m) * m


def _choose_batch_tile(batch, tb_max=1024):
    # Cover the batch in ~2 grid steps (v7x megacore), cap VMEM via tb_max,
    # keep the sublane dim a multiple of 8.
    half = _round_up(-(-batch // 2), 8)
    return max(8, min(tb_max, half))


def dqn_kernel(x_ref, w1_ref, b1_ref, w2_ref, b2_ref, w3_ref, b3_ref, o_ref):
    # x_ref: (tb, input_dim) f32; weights in compute dtype; biases f32.
    x = x_ref[...].astype(w1_ref.dtype)                 # cast in VMEM (VPU, cheap)
    h1 = jnp.dot(x, w1_ref[...], preferred_element_type=jnp.float32)
    h1 = jnp.maximum(h1 + b1_ref[...], 0.0)             # f32 bias add + ReLU (VPU)
    h2 = jnp.dot(h1.astype(w2_ref.dtype), w2_ref[...],
                 preferred_element_type=jnp.float32)
    h2 = jnp.maximum(h2 + b2_ref[...], 0.0)
    out = jnp.dot(h2.astype(w3_ref.dtype), w3_ref[...],
                  preferred_element_type=jnp.float32) + b3_ref[...]   # (tb, 128)
    # Lane-dense, 128x smaller head store: batch goes to the lane dim and only
    # the real q column (col 0 of the padded head) is written.
    out_t = jnp.transpose(out)                          # (128, tb), XLU
    o_ref[...] = out_t[0:1, :].reshape(o_ref.shape).astype(o_ref.dtype)


def prepare_params(params, compute_dtype=jnp.bfloat16):
    """One-time pad/cast of the DQN weights for the fused kernel.

    Call once outside the acting/training step and reuse the result; this keeps
    weight pad/cast HBM traffic out of the per-forward path.
    """
    w1, b1, w2, b2, w3, b3 = params
    input_dim, hidden_dim = w1.shape
    hid_pad = _round_up(hidden_dim, LANE)
    head_pad = LANE                                     # real q value is column 0

    def pad2(a, rows, cols, dtype):
        buf = jnp.zeros((rows, cols), jnp.float32)
        buf = buf.at[: a.shape[0], : a.shape[1]].set(a.astype(jnp.float32))
        return buf.astype(dtype)

    w1p = pad2(w1, input_dim, hid_pad, compute_dtype)   # input dim left unpadded
    b1p = pad2(b1, 1, hid_pad, jnp.float32)             # biases stay f32
    w2p = pad2(w2, hid_pad, hid_pad, compute_dtype)
    b2p = pad2(b2, 1, hid_pad, jnp.float32)
    w3p = pad2(w3, hid_pad, head_pad, compute_dtype)
    b3p = pad2(b3, 1, head_pad, jnp.float32)
    return (w1p, b1p, w2p, b2p, w3p, b3p)


@jax.jit
def dqn_forward(x, prepared_params):
    """x: (B, input_dim) f32; prepared_params: output of prepare_params."""
    w1, b1, w2, b2, w3, b3 = prepared_params
    B, input_dim = x.shape
    assert w1.shape[0] == input_dim

    tb = _choose_batch_tile(B)
    b_pad = _round_up(B, tb)
    num_tiles = b_pad // tb
    x_p = x if b_pad == B else jnp.pad(x, ((0, b_pad - B), (0, 0)))

    def resident(shape):  # constant block index -> weight stays VMEM-resident
        return pl.BlockSpec(shape, lambda i: tuple(0 for _ in shape))

    out = pl.pallas_call(
        dqn_kernel,
        out_shape=jax.ShapeDtypeStruct((num_tiles, 1, tb), jnp.float32),
        grid=(num_tiles,),
        in_specs=[
            # x tile walks the batch; feature dim == full array (no lane pad).
            pl.BlockSpec((tb, input_dim), lambda i: (i, 0)),
            resident(w1.shape), resident(b1.shape),
            resident(w2.shape), resident(b2.shape),
            resident(w3.shape), resident(b3.shape),
        ],
        out_specs=pl.BlockSpec((1, 1, tb), lambda i: (i, 0, 0)),
        compiler_params=pltpu.CompilerParams(
            dimension_semantics=("parallel",),  # shard batch steps across v7x TCs
            # For realistic hidden_dim (>=2048) on v7x, set vmem_limit_bytes
            # here and budget the resident bf16 weights against 64 MiB VMEM.
        ),
    )(x_p, w1, b1, w2, b2, w3, b3)

    # (num_tiles, 1, tb) -> (b_pad,) -> strip batch padding, keep 1-wide head.
    return out.reshape(b_pad, 1)[:B]


def init_params(key, input_dim, hidden_dim):
    # Deterministic init mimicking PyTorch nn.Linear default (U(+-1/sqrt(fan_in))),
    # with weights already stored as (in_features, out_features).
    keys = jax.random.split(key, 6)

    def linear(kw, kb, fan_in, fan_out):
        bound = 1.0 / jnp.sqrt(fan_in)
        w = jax.random.uniform(kw, (fan_in, fan_out), jnp.float32, -bound, bound)
        b = jax.random.uniform(kb, (1, fan_out), jnp.float32, -bound, bound)
        return w, b

    w1, b1 = linear(keys[0], keys[1], input_dim, hidden_dim)
    w2, b2 = linear(keys[2], keys[3], hidden_dim, hidden_dim)
    w3, b3 = linear(keys[4], keys[5], hidden_dim, 1)
    return (w1, b1, w2, b2, w3, b3)


def dqn_reference(x, params):
    w1, b1, w2, b2, w3, b3 = params
    hp = jax.lax.Precision.HIGHEST
    h1 = jnp.maximum(jnp.dot(x, w1, precision=hp) + b1, 0.0)
    h2 = jnp.maximum(jnp.dot(h1, w2, precision=hp) + b2, 0.0)
    return jnp.dot(h2, w3, precision=hp) + b3


if __name__ == "__main__":
    # Small, deterministic example: 2 batch tiles of 128 rows (2-step grid
    # exercises the parallel batch loop / both v7x TensorCores).
    batch = 256
    input_dim = 16
    hidden_dim = 32

    key = jax.random.PRNGKey(0)
    kx, kp = jax.random.split(key)
    x = jax.random.normal(kx, (batch, input_dim), jnp.float32)
    params = init_params(kp, input_dim, hidden_dim)

    ref = dqn_reference(x, params)

    # f32-operand path: tight numerical check of the fused kernel.
    prepared_f32 = prepare_params(params, compute_dtype=jnp.float32)
    out_f32 = jax.block_until_ready(dqn_forward(x, prepared_f32))
    assert out_f32.shape == (batch, 1)
    assert jnp.allclose(out_f32, ref, atol=1e-4, rtol=1e-4)

    # bf16-operand fast path (default on all generations: halved x/weight DMA
    # bytes, f32 accumulation + f32 bias/ReLU).
    prepared_bf16 = prepare_params(params, compute_dtype=jnp.bfloat16)
    out_bf16 = jax.block_until_ready(dqn_forward(x, prepared_bf16))
    assert out_bf16.shape == (batch, 1)
    assert jnp.allclose(out_bf16, ref, atol=5e-2, rtol=5e-2)

    print("KERNEL_OK")
</pallas_src>

<mosaic_0001>
module attributes {stable_mosaic.version = 11 : i64} {
  func.func @dqn_kernel(%arg0: i32, %arg1: memref<128x16xf32, #tpu.memory_space<vmem>>, %arg2: memref<16x128xf32, #tpu.memory_space<vmem>>, %arg3: memref<1x128xf32, #tpu.memory_space<vmem>>, %arg4: memref<128x128xf32, #tpu.memory_space<vmem>>, %arg5: memref<1x128xf32, #tpu.memory_space<vmem>>, %arg6: memref<128x128xf32, #tpu.memory_space<vmem>>, %arg7: memref<1x128xf32, #tpu.memory_space<vmem>>, %arg8: memref<1x1x128xf32, #tpu.memory_space<vmem>>) attributes {dimension_semantics = [#tpu.dimension_semantics<parallel>], iteration_bounds = array<i64: 2>, scalar_prefetch = 0 : i64, scratch_operands = 0 : i64, tpu.core_type = #tpu.core_type<tc>, window_params = [{transform_indices = @transform_0, window_bounds = array<i64: 128, 16>}, {pipeline_mode = #tpu.pipeline_mode<synchronous>, transform_indices = @transform_1, window_bounds = array<i64: 16, 128>}, {pipeline_mode = #tpu.pipeline_mode<synchronous>, transform_indices = @transform_2, window_bounds = array<i64: 1, 128>}, {pipeline_mode = #tpu.pipeline_mode<synchronous>, transform_indices = @transform_3, window_bounds = array<i64: 128, 128>}, {pipeline_mode = #tpu.pipeline_mode<synchronous>, transform_indices = @transform_4, window_bounds = array<i64: 1, 128>}, {pipeline_mode = #tpu.pipeline_mode<synchronous>, transform_indices = @transform_5, window_bounds = array<i64: 128, 128>}, {pipeline_mode = #tpu.pipeline_mode<synchronous>, transform_indices = @transform_6, window_bounds = array<i64: 1, 128>}, {transform_indices = @transform_7, window_bounds = array<i64: 1, 1, 128>}]} {
    %c0 = arith.constant 0 : index
    %c0_0 = arith.constant 0 : index
    %0 = vector.load %arg1[%c0, %c0_0] : memref<128x16xf32, #tpu.memory_space<vmem>>, vector<128x16xf32>
    %c0_1 = arith.constant 0 : index
    %c0_2 = arith.constant 0 : index
    %1 = vector.load %arg2[%c0_1, %c0_2] : memref<16x128xf32, #tpu.memory_space<vmem>>, vector<16x128xf32>
    %cst = arith.constant dense<0.000000e+00> : vector<128x128xf32>
    %2 = tpu.matmul %0, %1, %cst {dimension_numbers = #tpu.dot_dimension_numbers<[1], [0], [0], [1], [0, 0, 1, 1], [], []>} : vector<128x16xf32>, vector<16x128xf32>, vector<128x128xf32> -> vector<128x128xf32>
    %c0_3 = arith.constant 0 : index
    %c0_4 = arith.constant 0 : index
    %3 = vector.load %arg3[%c0_3, %c0_4] : memref<1x128xf32, #tpu.memory_space<vmem>>, vector<1x128xf32>
    %4 = vector.broadcast %3 : vector<1x128xf32> to vector<128x128xf32>
    %5 = arith.addf %2, %4 : vector<128x128xf32>
    %cst_5 = arith.constant 0.000000e+00 : f32
    %6 = vector.broadcast %cst_5 : f32 to vector<128x128xf32>
    %7 = arith.maximumf %5, %6 : vector<128x128xf32>
    %c0_6 = arith.constant 0 : index
    %c0_7 = arith.constant 0 : index
    %8 = vector.load %arg4[%c0_6, %c0_7] : memref<128x128xf32, #tpu.memory_space<vmem>>, vector<128x128xf32>
    %cst_8 = arith.constant dense<0.000000e+00> : vector<128x128xf32>
    %9 = tpu.matmul %7, %8, %cst_8 {dimension_numbers = #tpu.dot_dimension_numbers<[1], [0], [0], [1], [0, 0, 1, 1], [], []>} : vector<128x128xf32>, vector<128x128xf32>, vector<128x128xf32> -> vector<128x128xf32>
    %c0_9 = arith.constant 0 : index
    %c0_10 = arith.constant 0 : index
    %10 = vector.load %arg5[%c0_9, %c0_10] : memref<1x128xf32, #tpu.memory_space<vmem>>, vector<1x128xf32>
    %11 = vector.broadcast %10 : vector<1x128xf32> to vector<128x128xf32>
    %12 = arith.addf %9, %11 : vector<128x128xf32>
    %cst_11 = arith.constant 0.000000e+00 : f32
    %13 = vector.broadcast %cst_11 : f32 to vector<128x128xf32>
    %14 = arith.maximumf %12, %13 : vector<128x128xf32>
    %c0_12 = arith.constant 0 : index
    %c0_13 = arith.constant 0 : index
    %15 = vector.load %arg6[%c0_12, %c0_13] : memref<128x128xf32, #tpu.memory_space<vmem>>, vector<128x128xf32>
    %cst_14 = arith.constant dense<0.000000e+00> : vector<128x128xf32>
    %16 = tpu.matmul %14, %15, %cst_14 {dimension_numbers = #tpu.dot_dimension_numbers<[1], [0], [0], [1], [0, 0, 1, 1], [], []>} : vector<128x128xf32>, vector<128x128xf32>, vector<128x128xf32> -> vector<128x128xf32>
    %c0_15 = arith.constant 0 : index
    %c0_16 = arith.constant 0 : index
    %17 = vector.load %arg7[%c0_15, %c0_16] : memref<1x128xf32, #tpu.memory_space<vmem>>, vector<1x128xf32>
    %18 = vector.broadcast %17 : vector<1x128xf32> to vector<128x128xf32>
    %19 = arith.addf %16, %18 : vector<128x128xf32>
    %20 = tpu.transpose %19, [1, 0] : vector<128x128xf32> -> vector<128x128xf32>
    %21 = vector.extract_strided_slice %20 {offsets = [0, 0], sizes = [1, 128], strides = [1, 1]} : vector<128x128xf32> to vector<1x128xf32>
    %22 = vector.shape_cast %21 : vector<1x128xf32> to vector<1x1x128xf32>
    %c0_17 = arith.constant 0 : index
    %c0_18 = arith.constant 0 : index
    %c0_19 = arith.constant 0 : index
    %23 = vector.load %arg8[%c0_17, %c0_18, %c0_19] : memref<1x1x128xf32, #tpu.memory_space<vmem>>, vector<1x1x128xf32>
    tpu.vector_store %arg8[%c0_17, %c0_18, %c0_19], %22 {strides = array<i32>} : memref<1x1x128xf32, #tpu.memory_space<vmem>>, vector<1x1x128xf32>,
    return
  }
  func.func @transform_0(%arg0: i32) -> (i32, i32) {
    %c0_i32 = arith.constant 0 : i32
    %c0_i32_0 = arith.constant 0 : i32
    return %arg0, %c0_i32 : i32, i32
  }
  func.func @transform_1(%arg0: i32) -> (i32, i32) {
    %c0_i32 = arith.constant 0 : i32
    %c0_i32_0 = arith.constant 0 : i32
    %c0_i32_1 = arith.constant 0 : i32
    return %c0_i32, %c0_i32_0 : i32, i32
  }
  func.func @transform_2(%arg0: i32) -> (i32, i32) {
    %c0_i32 = arith.constant 0 : i32
    %c0_i32_0 = arith.constant 0 : i32
    %c0_i32_1 = arith.constant 0 : i32
    return %c0_i32, %c0_i32_0 : i32, i32
  }
  func.func @transform_3(%arg0: i32) -> (i32, i32) {
    %c0_i32 = arith.constant 0 : i32
    %c0_i32_0 = arith.constant 0 : i32
    %c0_i32_1 = arith.constant 0 : i32
    return %c0_i32, %c0_i32_0 : i32, i32
  }
  func.func @transform_4(%arg0: i32) -> (i32, i32) {
    %c0_i32 = arith.constant 0 : i32
    %c0_i32_0 = arith.constant 0 : i32
    %c0_i32_1 = arith.constant 0 : i32
    return %c0_i32, %c0_i32_0 : i32, i32
  }
  func.func @transform_5(%arg0: i32) -> (i32, i32) {
    %c0_i32 = arith.constant 0 : i32
    %c0_i32_0 = arith.constant 0 : i32
    %c0_i32_1 = arith.constant 0 : i32
    return %c0_i32, %c0_i32_0 : i32, i32
  }
  func.func @transform_6(%arg0: i32) -> (i32, i32) {
    %c0_i32 = arith.constant 0 : i32
    %c0_i32_0 = arith.constant 0 : i32
    %c0_i32_1 = arith.constant 0 : i32
    return %c0_i32, %c0_i32_0 : i32, i32
  }
  func.func @transform_7(%arg0: i32) -> (i32, i32, i32) {
    %c0_i32 = arith.constant 0 : i32
    %c0_i32_0 = arith.constant 0 : i32
    %c0_i32_1 = arith.constant 0 : i32
    return %arg0, %c0_i32, %c0_i32_0 : i32, i32, i32
  }
}

</mosaic_0001>

<bundles_post_ra>
// kernel: dqn_forward.1
= control target key start
LH: loop header
LB: loop body
LE: loop exit
PB: predicated region body
PF: predicated region fallthrough
CT: control target
= control target key end

     0   :  { %12 = vsyncpa [#allocation3], 0  ;;  %s1595_s0 = inlined_call_operand.vmem [shape: f32[256,16], index: 0, kind: input, shape index: {}]   ;;  %s1596_s1 = inlined_call_operand.vmem [shape: f32[16,128], index: 1, kind: input, shape index: {}]   ;;  %s1597_s2 = inlined_call_operand.vmem [shape: f32[1,128], index: 2, kind: input, shape index: {}]   ;;  %s1598_s3 = inlined_call_operand.vmem [shape: f32[128,128], index: 3, kind: input, shape index: {}]   ;;  %s1599_s4 = inlined_call_operand.vmem [shape: f32[1,128], index: 4, kind: input, shape index: {}]   ;;  %s1600_s5 = inlined_call_operand.vmem [shape: f32[128,128], index: 5, kind: input, shape index: {}]   ;;  %s1601_s6 = inlined_call_operand.vmem [shape: f32[1,128], index: 6, kind: input, shape index: {}]   ;;  %s1602_s7 = inlined_call_operand.hbm [shape: f32[2,1,128], index: 7, kind: output, shape index: {}]  }
   0x1   :  { %14 = vsyncpa [#allocation3 + $0x1], 0  ;;  %s1358_s24 = smov 0   ;;  %s1360_s25 = smov 0  }
   0x2   :  { %s1362_s26 = smov 0   ;;  %s1364_s27 = smov 0  }
   0x3 LB: > { %s965_s28 = sadd.s32 4294967295, %s1315_s27   ;;  %s966_s29 = sadd.s32 4294967294, %s1315_s27   ;;  %s1315_s27 = sphi %s1364_s27, %s1608_s27   ;;  %s1311_s26 = sphi %s1362_s26, %s1607_s26   ;;  %s1307_s25 = sphi %s1360_s25, %s1606_s25   ;;  %s1303_s24 = sphi %s1358_s24, %s1605_s24  }
   0x4   : > { %s1381_s30 = sadd.s32 1, %s1315_s27   ;;  %s179_s8 = sadd.s32 1, %s1311_s26 }
   0x5   : > { %s176_s9 = ssub.s32 %s1315_s27, %s1381_s30  ;;  %p189_p0 = scmp.ne.s32.totalorder %s1311_s26, %s1307_s25 }
   0x6   : > { %p177_p1 = scmp.eq.s32.totalorder %s176_s9, 0  ;;  %p190_p2 = scmp.eq.s32.totalorder %s965_s28, 1 }
   0x7   : > { %p195_p3 = scmp.ne.s32.totalorder %s1307_s25, %s1303_s24  ;;  %p196_p4 = scmp.eq.s32.totalorder %s966_s29, 1 }
   0x8   : > { %s1391_s10 = scalar_select %p177_p1, %s1311_s26, %s179_s8  }
   0x9   : > { %p1393_p5 = por %p190_p2, %p189_p0  ;;  %p1397_p6 = por %p196_p4, %p195_p3 }
   0xa   : > { %p969_p7 = scmp.ge.s32.totalorder %s1315_s27, 1  ;;  %p241_p8 = scmp.lt.s32.totalorder %s1315_s27, 3 }
   0xc   : > { %p242_p9 = pnand %p969_p7, %p241_p8 }
   0xd   : > { %s1409_s17 = sshll.u32 (!%p242_p9), %s965_s28, 4  ;;  %s1317_s18 = smov (!%p242_p9), [#allocation2]  }
   0xe   : > { %245 = sbr.rel (%p242_p9) target bundleno = 760 (0x2f8), region = 48  ;;  %p273_p10 = scmp.lt.s32.totalorder (!%p242_p9), %s1409_s17, 31 }
   0xf   : > { %s909_s13 = scalar_lea.hbm (!%p242_p9), %s1602_s7, %s1409_s17  ;;  %s1259_s19 = sshll.u32 (!%p242_p9), %s1317_s18, 4  ;;  %s1260_s19 = int_to_ptr.vmem [resolvable:$false] %s1259_s19 }
  0x10   : > { %s1261_s20 = scalar_lea.vmem (!%p242_p9), %s1260_s19, 32 }
  0x13   : > { %v295_v0 = vld [vmem:[%s1596_s1 + $0x8] sm:$0xff]  ;;  %v294_v1 = vld [vmem:[%s1596_s1] sm:$0xff]  ;;  %v528_v2 = vld [vmem:[%s1598_s3 + $0x78] sm:$0xff]  ;;  %s274_s28 = scalar_select %p273_p10, %s1409_s17, 31  ;;  %vm303_vm0 = vcmask 130048  }
  0x14   : > { %1076 = vmatprep.subr.mxu0 %v295_v0  ;;  %1104 = vmatprep.subr.mxu1 %v528_v2  ;;  %v527_v3 = vld [vmem:[%s1598_s3 + $0x70] sm:$0xff]  ;;  %v526_v4 = vld [vmem:[%s1598_s3 + $0x68] sm:$0xff]  ;;  %v525_v5 = vld [vmem:[%s1598_s3 + $0x60] sm:$0xff] }
  0x15   : > { %1077 = vmatpush3.msra.mxu0 %v295_v0  ;;  %1105 = vmatpush3.msra.mxu1 %v528_v2  ;;  %s971_s9 = sshll.u32 %s274_s28, 3  ;;  %v524_v6 = vld [vmem:[%s1598_s3 + $0x58] sm:$0xff]  ;;  %v523_v10 = vld [vmem:[%s1598_s3 + $0x50] sm:$0xff]  ;;  %v522_v12 = vld [vmem:[%s1598_s3 + $0x48] sm:$0xff]  ;;  %s270_s28 = sand.u32 1, %s1307_s25  }
  0x16   : > { %1078 = vmatprep.subr.mxu0 %v294_v1  ;;  %1106 = vmatprep.subr.mxu1 %v527_v3  ;;  %s1428_s15 = scalar_lea.vmem %s1595_s0, %s971_s9  ;;  %v521_v14 = vld [vmem:[%s1598_s3 + $0x40] sm:$0xff]  ;;  %v520_v16 = vld [vmem:[%s1598_s3 + $0x38] sm:$0xff]  ;;  %v519_v18 = vld [vmem:[%s1598_s3 + $0x30] sm:$0xff]  ;;  %s271_s29 = scalar_lea.vmem [#allocation2], %s270_s28 }
  0x17   : > { %1079 = vmatpush3.msra.mxu0 %v294_v1  ;;  %1107 = vmatpush3.msra.mxu1 %v527_v3  ;;  %v278_v7 = vld [vmem:[%s1428_s15] sm:$0xff]  ;;  %v279_v8 = vld [vmem:[%s1428_s15 + $0x8] sm:$0xff]  ;;  %v280_v9 = vld [vmem:[%s1428_s15 + $0x10] sm:$0xff]  ;;  %s899_s14 = scalar_lea.sflag [#allocation3], %s270_s28 }
  0x18   : > { %1108 = vmatprep.subr.mxu1 %v526_v4  ;;  %1080 = vmatprep.mubr.msk.f32.mxu0 %vm303_vm0, %v278_v7  ;;  %v281_v11 = vld [vmem:[%s1428_s15 + $0x18] sm:$0xff]  ;;  %v282_v13 = vld [vmem:[%s1428_s15 + $0x20] sm:$0xff]  ;;  %v283_v15 = vld [vmem:[%s1428_s15 + $0x28] sm:$0xff] }
  0x19   : > { %1109 = vmatpush3.msra.mxu1 %v526_v4  ;;  %1081 = vmatmul.mubr.msk.f32.vlgmr.msra.gmra.mxu0 %vm303_vm0, %v279_v8  ;;  %v284_v17 = vld [vmem:[%s1428_s15 + $0x30] sm:$0xff]  ;;  %v285_v19 = vld [vmem:[%s1428_s15 + $0x38] sm:$0xff]  ;;  %v518_v20 = vld [vmem:[%s1598_s3 + $0x28] sm:$0xff] }
  0x1a   : > { %1110 = vmatprep.subr.mxu1 %v525_v5  ;;  %1083 = vmatprep.mubr.msk.f32.mxu0 %vm303_vm0, %v280_v9  ;;  %v286_v21 = vld [vmem:[%s1428_s15 + $0x40] sm:$0xff]  ;;  %v287_v23 = vld [vmem:[%s1428_s15 + $0x48] sm:$0xff]  ;;  %v288_v24 = vld [vmem:[%s1428_s15 + $0x50] sm:$0xff] }
  0x1b   : > { %1111 = vmatpush3.msra.mxu1 %v525_v5  ;;  %v517_v22 = vld [vmem:[%s1598_s3 + $0x20] sm:$0xff]  ;;  %v289_v25 = vld [vmem:[%s1428_s15 + $0x58] sm:$0xff]  ;;  %v291_v27 = vld [vmem:[%s1428_s15 + $0x68] sm:$0xff] }
  0x1c   : > { %1112 = vmatprep.subr.mxu1 %v524_v6  ;;  %v290_v26 = vld [vmem:[%s1428_s15 + $0x60] sm:$0xff]  ;;  %v292_v28 = vld [vmem:[%s1428_s15 + $0x70] sm:$0xff]  ;;  %v293_v29 = vld [vmem:[%s1428_s15 + $0x78] sm:$0xff]  ;;  %s911_s15 = sshll.u32 %s271_s29, 4  ;;  %s1556_s15 = int_to_ptr.vmem [resolvable:$true] %s911_s15 }
  0x1d   : > { %1113 = vmatpush3.msra.mxu1 %v524_v6  ;;  %1084 = vmatmul.mubr.msk.f32.gmra.mxu0 %vm303_vm0, %v281_v11  ;;  %v516_v30 = vld [vmem:[%s1598_s3 + $0x18] sm:$0xff]  ;;  %v515_v31 = vld [vmem:[%s1598_s3 + $0x10] sm:$0xff]  ;;  %v514_v32 = vld [vmem:[%s1598_s3 + $0x8] sm:$0xff]  ;;  %s1255_s16 = scalar_lea.vmem %s1556_s15, 16  ;;  %p1262_p0 = scmp.lt.s32.totalorder %s1556_s15, %s1260_s19 }
  0x1e   : > { %1114 = vmatprep.subr.mxu1 %v523_v10  ;;  %1086 = vmatprep.mubr.msk.f32.mxu0 %vm303_vm0, %v282_v13  ;;  %v513_v33 = vld [vmem:[%s1598_s3] sm:$0xff]  ;;  %v712_v34 = vld [vmem:[%s1600_s5 + $0x78] sm:$0xff]  ;;  %v711_v35 = vld [vmem:[%s1600_s5 + $0x70] sm:$0xff]  ;;  %p1256_p11 = scmp.ne.s32.totalorder %s1556_s15, %s1255_s16  ;;  %p1263_p1 = scmp.lt.s32.totalorder %s1261_s20, %s1255_s16 }
  0x1f   : > { %1115 = vmatpush3.msra.mxu1 %v523_v10  ;;  %1160 = vmatprep.subr.mxu0 %v712_v34  ;;  %v710_v36 = vld [vmem:[%s1600_s5 + $0x68] sm:$0xff]  ;;  %v709_v37 = vld [vmem:[%s1600_s5 + $0x60] sm:$0xff]  ;;  %v708_v38 = vld [vmem:[%s1600_s5 + $0x58] sm:$0xff] }
  0x20   : > { %1116 = vmatprep.subr.mxu1 %v522_v12  ;;  %1161 = vmatpush3.msra.mxu0 %v712_v34  ;;  %v707_v39 = vld [vmem:[%s1600_s5 + $0x50] sm:$0xff]  ;;  %v706_v40 = vld [vmem:[%s1600_s5 + $0x48] sm:$0xff]  ;;  %v705_v41 = vld [vmem:[%s1600_s5 + $0x40] sm:$0xff]  ;;  %p1257_p12 = pnand %p1256_p11, %p1393_p5  ;;  %p1264_p2 = por %p1263_p1, %p1262_p0 }
  0x21   : > { %1117 = vmatpush3.msra.mxu1 %v522_v12  ;;  %1087 = vmatmul.mubr.msk.f32.gmra.mxu0 %vm303_vm0, %v283_v15  ;;  %v704_v42 = vld [vmem:[%s1600_s5 + $0x38] sm:$0xff]  ;;  %v703_v43 = vld [vmem:[%s1600_s5 + $0x30] sm:$0xff]  ;;  %v702_v44 = vld [vmem:[%s1600_s5 + $0x28] sm:$0xff] }
  0x22   : > { %1118 = vmatprep.subr.mxu1 %v521_v14  ;;  %1089 = vmatprep.mubr.msk.f32.mxu0 %vm303_vm0, %v284_v17  ;;  %v701_v45 = vld [vmem:[%s1600_s5 + $0x20] sm:$0xff]  ;;  %v700_v46 = vld [vmem:[%s1600_s5 + $0x18] sm:$0xff]  ;;  %p1258_p13 = pneg %p1257_p12 }
  0x23   : > { %1119 = vmatpush3.msra.mxu1 %v521_v14  ;;  %1162 = vmatprep.subr.mxu0 %v711_v35  ;;  %v972_v47 = vld [vmem:[%s1597_s2] ss:$0 sm:$0xff] }
  0x24   : > { %1120 = vmatprep.subr.mxu1 %v520_v16  ;;  %1163 = vmatpush3.msra.mxu0 %v711_v35  ;;  %v697_v34 = vld [vmem:[%s1600_s5] sm:$0xff]  ;;  %p1265_p3 = pnand %p1264_p2, %p1258_p13 }
  0x25   : > { %1121 = vmatpush3.msra.mxu1 %v520_v16  ;;  %1090 = vmatmul.mubr.msk.f32.gmra.mxu0 %vm303_vm0, %v285_v19  ;;  %v989_v35 = vld [vmem:[%s1599_s4] ss:$0 sm:$0xff] }
  0x26   : > { %1122 = vmatprep.subr.mxu1 %v519_v18  ;;  %1092 = vmatprep.mubr.msk.f32.mxu0 %vm303_vm0, %v286_v21 }
  0x27   : > { %1123 = vmatpush3.msra.mxu1 %v519_v18  ;;  %1164 = vmatprep.subr.mxu0 %v710_v36 }
  0x28   : > { %1124 = vmatprep.subr.mxu1 %v518_v20  ;;  %1165 = vmatpush3.msra.mxu0 %v710_v36 }
  0x29   : > { %1125 = vmatpush3.msra.mxu1 %v518_v20  ;;  %1093 = vmatmul.mubr.msk.f32.gmra.mxu0 %vm303_vm0, %v287_v23 }
  0x2a   : > { %1126 = vmatprep.subr.mxu1 %v517_v22  ;;  %1095 = vmatprep.mubr.msk.f32.mxu0 %vm303_vm0, %v288_v24 }
  0x2b   : > { %1127 = vmatpush3.msra.mxu1 %v517_v22  ;;  %1166 = vmatprep.subr.mxu0 %v709_v37 }
  0x2c   : > { %1128 = vmatprep.subr.mxu1 %v516_v30  ;;  %1167 = vmatpush3.msra.mxu0 %v709_v37 }
  0x2d   : > { %1096 = vmatmul.mubr.msk.f32.gmra.mxu0 %vm303_vm0, %v289_v25  ;;  %1129 = vmatpush3.msra.mxu1 %v516_v30 }
  0x2e   : > { %1098 = vmatprep.mubr.msk.f32.mxu0 %vm303_vm0, %v290_v26  ;;  %1130 = vmatprep.subr.mxu1 %v515_v31 }
  0x2f   : > { %1131 = vmatpush3.msra.mxu1 %v515_v31  ;;  %1168 = vmatprep.subr.mxu0 %v708_v38 }
  0x30   : > { %1132 = vmatprep.subr.mxu1 %v514_v32  ;;  %1169 = vmatpush3.msra.mxu0 %v708_v38 }
  0x31   : > { %1099 = vmatmul.mubr.msk.f32.gmra.mxu0 %vm303_vm0, %v291_v27  ;;  %1133 = vmatpush3.msra.mxu1 %v514_v32  ;;  %v699_v32 = vld [vmem:[%s1600_s5 + $0x10] sm:$0xff] }
  0x32   : > { %1101 = vmatprep.mubr.msk.f32.mxu0 %vm303_vm0, %v292_v28  ;;  %1134 = vmatprep.subr.mxu1 %v513_v33 }
  0x33   : > { %1135 = vmatpush3.msra.mxu1 %v513_v33  ;;  %1170 = vmatprep.subr.mxu0 %v707_v39  ;;  %v698_v33 = vld [vmem:[%s1600_s5 + $0x8] sm:$0xff] }
  0x34   : > { %1171 = vmatpush3.msra.mxu0 %v707_v39 }
  0x35   : > { %1102 = vmatmul.mubr.msk.f32.gmra.mxu0 %vm303_vm0, %v293_v29  ;;  %1172 = vmatprep.subr.mxu0 %v706_v40 }
  0x36   : > { %1173 = vmatpush3.msra.mxu0 %v706_v40 }
  0x37   : > { %1174 = vmatprep.subr.mxu0 %v705_v41 }
  0x38   : > { %1175 = vmatpush3.msra.mxu0 %v705_v41 }
  0x39   : > { %1176 = vmatprep.subr.mxu0 %v704_v42 }
  0x3a   : > { %1177 = vmatpush3.msra.mxu0 %v704_v42 }
  0x3b   : > { %1178 = vmatprep.subr.mxu0 %v703_v43 }
  0x3c   : > { %1179 = vmatpush3.msra.mxu0 %v703_v43 }
  0x3d   : > { %1180 = vmatprep.subr.mxu0 %v702_v44 }
  0x3e   : > { %1181 = vmatpush3.msra.mxu0 %v702_v44 }
  0x3f   : > { %1182 = vmatprep.subr.mxu0 %v701_v45 }
  0x40   : > { %1183 = vmatpush3.msra.mxu0 %v701_v45 }
  0x41   : > { %1184 = vmatprep.subr.mxu0 %v700_v46 }
  0x42   : > { %1185 = vmatpush3.msra.mxu0 %v700_v46 }
  0x43   : > { %1186 = vmatprep.subr.mxu0 %v699_v32 }
  0x44   : > { %1187 = vmatpush3.msra.mxu0 %v699_v32 }
  0x45   : > { %1188 = vmatprep.subr.mxu0 %v698_v33 }
  0x46   : > { %1189 = vmatpush3.msra.mxu0 %v698_v33 }
  0x47   : > { %1190 = vmatprep.subr.mxu0 %v697_v34 }
  0x48   : > { %1191 = vmatpush3.msra.mxu0 %v697_v34 }
  0xd9   : > { %v1082_v48 = vpop.f32.mrf.mxu0 }
  0xda   : > { %v424_v49 = vadd.f32 %v1082_v48, %v972_v47 }
  0xdb   : > { %v418_v50 = vpop.f32.mrf.mxu0 }
  0xdc   : > { %v419_v51 = vadd.f32 %v972_v47, %v418_v50  ;;  %v498_v55 = vmax.f32 %v424_v49, 0.0 }
  0xdd   : > { %v1085_v52 = vpop.f32.mrf.mxu0 }
  0xde   : > { %v434_v53 = vadd.f32 %v1085_v52, %v972_v47  ;;  %v497_v54 = vmax.f32 %v419_v51, 0.0 }
  0xdf   : > { %v428_v56 = vpop.f32.mrf.mxu0 }
  0xe0   : > { %v429_v57 = vadd.f32 %v972_v47, %v428_v56  ;;  %1136 = vmatprep.mubr.f32.mxu1 %v497_v54  ;;  %v500_v58 = vmax.f32 %v434_v53, 0.0 }
  0xe1   : > { %v1088_v59 = vpop.f32.mrf.mxu0  ;;  %1137 = vmatmul.mubr.f32.vlgmr.msra.gmra.mxu1 %v498_v55 }
  0xe2   : > { %v499_v60 = vmax.f32 %v429_v57, 0.0  ;;  %v444_v61 = vadd.f32 %v1088_v59, %v972_v47 }
  0xe3   : > { %v438_v62 = vpop.f32.mrf.mxu0 }
  0xe4   : > { %v439_v63 = vadd.f32 %v972_v47, %v438_v62  ;;  %1139 = vmatprep.mubr.f32.mxu1 %v499_v60  ;;  %v502_v0 = vmax.f32 %v444_v61, 0.0 }
  0xe5   : > { %1140 = vmatmul.mubr.f32.gmra.mxu1 %v500_v58  ;;  %v1091_v1 = vpop.f32.mrf.mxu0 }
  0xe6   : > { %v501_v2 = vmax.f32 %v439_v63, 0.0  ;;  %v454_v3 = vadd.f32 %v1091_v1, %v972_v47 }
  0xe7   : > { %v448_v4 = vpop.f32.mrf.mxu0 }
  0xe8   : > { %1142 = vmatprep.mubr.f32.mxu1 %v501_v2  ;;  %v449_v5 = vadd.f32 %v972_v47, %v448_v4  ;;  %v504_v6 = vmax.f32 %v454_v3, 0.0 }
  0xe9   : > { %1143 = vmatmul.mubr.f32.gmra.mxu1 %v502_v0  ;;  %v1094_v7 = vpop.f32.mrf.mxu0 }
  0xea   : > { %v503_v8 = vmax.f32 %v449_v5, 0.0  ;;  %v464_v9 = vadd.f32 %v1094_v7, %v972_v47 }
  0xeb   : > { %v458_v10 = vpop.f32.mrf.mxu0 }
  0xec   : > { %1145 = vmatprep.mubr.f32.mxu1 %v503_v8  ;;  %v459_v11 = vadd.f32 %v972_v47, %v458_v10  ;;  %v506_v12 = vmax.f32 %v464_v9, 0.0 }
  0xed   : > { %1146 = vmatmul.mubr.f32.gmra.mxu1 %v504_v6  ;;  %v1097_v13 = vpop.f32.mrf.mxu0 }
  0xee   : > { %v505_v14 = vmax.f32 %v459_v11, 0.0  ;;  %v474_v15 = vadd.f32 %v1097_v13, %v972_v47 }
  0xef   : > { %v468_v16 = vpop.f32.mrf.mxu0 }
  0xf0   : > { %1148 = vmatprep.mubr.f32.mxu1 %v505_v14  ;;  %v469_v17 = vadd.f32 %v972_v47, %v468_v16  ;;  %v508_v18 = vmax.f32 %v474_v15, 0.0 }
  0xf1   : > { %1149 = vmatmul.mubr.f32.gmra.mxu1 %v506_v12  ;;  %v1100_v19 = vpop.f32.mrf.mxu0 }
  0xf2   : > { %v507_v20 = vmax.f32 %v469_v17, 0.0  ;;  %v484_v21 = vadd.f32 %v1100_v19, %v972_v47 }
  0xf3   : > { %v478_v22 = vpop.f32.mrf.mxu0 }
  0xf4   : > { %1151 = vmatprep.mubr.f32.mxu1 %v507_v20  ;;  %v479_v23 = vadd.f32 %v972_v47, %v478_v22  ;;  %v510_v24 = vmax.f32 %v484_v21, 0.0  ;;  %v990_v21 = vld [vmem:[%s1601_s6] ss:$0 sm:$0xff] }
  0xf5   : > { %1152 = vmatmul.mubr.f32.gmra.mxu1 %v508_v18  ;;  %v1103_v25 = vpop.f32.mrf.mxu0 }
  0xf6   : > { %v509_v26 = vmax.f32 %v479_v23, 0.0  ;;  %v494_v27 = vadd.f32 %v1103_v25, %v972_v47 }
  0xf7   : > { %v488_v28 = vpop.f32.mrf.mxu0 }
  0xf8   : > { %1154 = vmatprep.mubr.f32.mxu1 %v509_v26  ;;  %v489_v29 = vadd.f32 %v972_v47, %v488_v28  ;;  %v512_v30 = vmax.f32 %v494_v27, 0.0 }
  0xf9   : > { %1155 = vmatmul.mubr.f32.gmra.mxu1 %v510_v24 }
  0xfa   : > { %v511_v31 = vmax.f32 %v489_v29, 0.0 }
  0xfc   : > { %1157 = vmatprep.mubr.f32.mxu1 %v511_v31 }
  0xfd   : > { %1158 = vmatmul.mubr.f32.gmra.mxu1 %v512_v30 }
 0x1a1   : > { %v1138_v36 = vpop.f32.mrf.mxu1 }
 0x1a2   : > { %v608_v37 = vadd.f32 %v1138_v36, %v989_v35 }
 0x1a3   : > { %v602_v38 = vpop.f32.mrf.mxu1 }
 0x1a4   : > { %v603_v39 = vadd.f32 %v989_v35, %v602_v38  ;;  %v682_v42 = vmax.f32 %v608_v37, 0.0 }
 0x1a5   : > { %v1141_v40 = vpop.f32.mrf.mxu1 }
 0x1a6   : > { %v681_v41 = vmax.f32 %v603_v39, 0.0  ;;  %v618_v43 = vadd.f32 %v1141_v40, %v989_v35 }
 0x1a7   : > { %v612_v44 = vpop.f32.mrf.mxu1 }
 0x1a8   : > { %v613_v45 = vadd.f32 %v989_v35, %v612_v44  ;;  %1192 = vmatprep.mubr.f32.mxu0 %v681_v41  ;;  %v684_v49 = vmax.f32 %v618_v43, 0.0 }
 0x1a9   : > { %v1144_v46 = vpop.f32.mrf.mxu1  ;;  %1193 = vmatmul.mubr.f32.vlgmr.msra.gmra.mxu0 %v682_v42 }
 0x1aa   : > { %v683_v47 = vmax.f32 %v613_v45, 0.0  ;;  %v628_v48 = vadd.f32 %v1144_v46, %v989_v35 }
 0x1ab   : > { %v622_v50 = vpop.f32.mrf.mxu1 }
 0x1ac   : > { %v623_v51 = vadd.f32 %v989_v35, %v622_v50  ;;  %1195 = vmatprep.mubr.f32.mxu0 %v683_v47  ;;  %v686_v52 = vmax.f32 %v628_v48, 0.0 }
 0x1ad   : > { %1196 = vmatmul.mubr.f32.gmra.mxu0 %v684_v49  ;;  %v1147_v53 = vpop.f32.mrf.mxu1 }
 0x1ae   : > { %v685_v54 = vmax.f32 %v623_v51, 0.0  ;;  %v638_v55 = vadd.f32 %v1147_v53, %v989_v35 }
 0x1af   : > { %v632_v56 = vpop.f32.mrf.mxu1 }
 0x1b0   : > { %1198 = vmatprep.mubr.f32.mxu0 %v685_v54  ;;  %v633_v57 = vadd.f32 %v989_v35, %v632_v56  ;;  %v688_v58 = vmax.f32 %v638_v55, 0.0 }
 0x1b1   : > { %1199 = vmatmul.mubr.f32.gmra.mxu0 %v686_v52  ;;  %v1150_v59 = vpop.f32.mrf.mxu1 }
 0x1b2   : > { %v687_v60 = vmax.f32 %v633_v57, 0.0  ;;  %v648_v61 = vadd.f32 %v1150_v59, %v989_v35 }
 0x1b3   : > { %v642_v62 = vpop.f32.mrf.mxu1 }
 0x1b4   : > { %1201 = vmatprep.mubr.f32.mxu0 %v687_v60  ;;  %v643_v63 = vadd.f32 %v989_v35, %v642_v62  ;;  %v690_v0 = vmax.f32 %v648_v61, 0.0 }
 0x1b5   : > { %1202 = vmatmul.mubr.f32.gmra.mxu0 %v688_v58  ;;  %v1153_v1 = vpop.f32.mrf.mxu1 }
 0x1b6   : > { %v689_v2 = vmax.f32 %v643_v63, 0.0  ;;  %v658_v3 = vadd.f32 %v1153_v1, %v989_v35 }
 0x1b7   : > { %v652_v4 = vpop.f32.mrf.mxu1 }
 0x1b8   : > { %1204 = vmatprep.mubr.f32.mxu0 %v689_v2  ;;  %v653_v5 = vadd.f32 %v989_v35, %v652_v4  ;;  %v692_v6 = vmax.f32 %v658_v3, 0.0 }
 0x1b9   : > { %1205 = vmatmul.mubr.f32.gmra.mxu0 %v690_v0  ;;  %v1156_v7 = vpop.f32.mrf.mxu1 }
 0x1ba   : > { %v691_v8 = vmax.f32 %v653_v5, 0.0  ;;  %v668_v9 = vadd.f32 %v1156_v7, %v989_v35 }
 0x1bb   : > { %v662_v10 = vpop.f32.mrf.mxu1 }
 0x1bc   : > { %1207 = vmatprep.mubr.f32.mxu0 %v691_v8  ;;  %v663_v11 = vadd.f32 %v989_v35, %v662_v10  ;;  %v694_v12 = vmax.f32 %v668_v9, 0.0 }
 0x1bd   : > { %1208 = vmatmul.mubr.f32.gmra.mxu0 %v692_v6  ;;  %v1159_v13 = vpop.f32.mrf.mxu1 }
 0x1be   : > { %v693_v14 = vmax.f32 %v663_v11, 0.0  ;;  %v678_v15 = vadd.f32 %v1159_v13, %v989_v35 }
 0x1bf   : > { %v672_v16 = vpop.f32.mrf.mxu1 }
 0x1c0   : > { %1210 = vmatprep.mubr.f32.mxu0 %v693_v14  ;;  %v673_v17 = vadd.f32 %v989_v35, %v672_v16  ;;  %v696_v18 = vmax.f32 %v678_v15, 0.0 }
 0x1c1   : > { %1211 = vmatmul.mubr.f32.gmra.mxu0 %v694_v12 }
 0x1c2   : > { %v695_v19 = vmax.f32 %v673_v17, 0.0 }
 0x1c4   : > { %1213 = vmatprep.mubr.f32.mxu0 %v695_v19 }
 0x1c5   : > { %1214 = vmatmul.mubr.f32.gmra.mxu0 %v696_v18 }
 0x269   : > { %v1194_v20 = vpop.f32.mrf.mxu0 }
 0x26a   : > { %v792_v25 = vadd.f32 %v1194_v20, %v990_v21 }
 0x26b   : > { %v786_v22 = vpop.f32.mrf.mxu0 }
 0x26c   : > { %v787_v23 = vadd.f32 %v990_v21, %v786_v22 }
 0x26d   : > { %v1197_v24 = vpop.f32.mrf.mxu0 }
 0x26e   : > { %865 = vxpose.xlu0.b32.start [1/16] (narrow) %v787_v23, 8  ;;  %v802_v29 = vadd.f32 %v1197_v24, %v990_v21 }
 0x26f   : > { %v796_v26 = vpop.f32.mrf.mxu0 }
 0x270   : > { %v797_v27 = vadd.f32 %v990_v21, %v796_v26 }
 0x271   : > { %v1200_v28 = vpop.f32.mrf.mxu0 }
 0x272   : > { %866 = vxpose.xlu0.b32.cont [2/16] (narrow) %v792_v25, 8  ;;  %v812_v33 = vadd.f32 %v1200_v28, %v990_v21 }
 0x273   : > { %v806_v30 = vpop.f32.mrf.mxu0 }
 0x274   : > { %v807_v31 = vadd.f32 %v990_v21, %v806_v30 }
 0x275   : > { %v1203_v32 = vpop.f32.mrf.mxu0 }
 0x276   : > { %867 = vxpose.xlu0.b32.cont [3/16] (narrow) %v797_v27, 8  ;;  %v822_v37 = vadd.f32 %v1203_v32, %v990_v21 }
 0x277   : > { %v816_v34 = vpop.f32.mrf.mxu0 }
 0x278   : > { %v817_v35 = vadd.f32 %v990_v21, %v816_v34 }
 0x279   : > { %v1206_v36 = vpop.f32.mrf.mxu0 }
 0x27a   : > { %868 = vxpose.xlu0.b32.cont [4/16] (narrow) %v802_v29, 8  ;;  %v832_v41 = vadd.f32 %v1206_v36, %v990_v21 }
 0x27b   : > { %v826_v38 = vpop.f32.mrf.mxu0 }
 0x27c   : > { %v827_v39 = vadd.f32 %v990_v21, %v826_v38 }
 0x27d   : > { %v1209_v40 = vpop.f32.mrf.mxu0 }
 0x27e   : > { %869 = vxpose.xlu0.b32.cont [5/16] (narrow) %v807_v31, 8  ;;  %v842_v45 = vadd.f32 %v1209_v40, %v990_v21 }
 0x27f   : > { %v836_v42 = vpop.f32.mrf.mxu0 }
 0x280   : > { %v837_v43 = vadd.f32 %v990_v21, %v836_v42 }
 0x281   : > { %v1212_v44 = vpop.f32.mrf.mxu0 }
 0x282   : > { %870 = vxpose.xlu0.b32.cont [6/16] (narrow) %v812_v33, 8  ;;  %v852_v49 = vadd.f32 %v1212_v44, %v990_v21 }
 0x283   : > { %v846_v46 = vpop.f32.mrf.mxu0 }
 0x284   : > { %v847_v47 = vadd.f32 %v990_v21, %v846_v46 }
 0x285   : > { %v1215_v48 = vpop.f32.mrf.mxu0 }
 0x286   : > { %871 = vxpose.xlu0.b32.cont [7/16] (narrow) %v817_v35, 8  ;;  %v862_v52 = vadd.f32 %v1215_v48, %v990_v21 }
 0x287   : > { %v856_v50 = vpop.f32.mrf.mxu0 }
 0x288   : > { %v857_v51 = vadd.f32 %v990_v21, %v856_v50 }
 0x28a   : > { %872 = vxpose.xlu0.b32.cont [8/16] (narrow) %v822_v37, 8 }
 0x28e   : > { %873 = vxpose.xlu0.b32.cont [9/16] (narrow) %v827_v39, 8 }
 0x292   : > { %874 = vxpose.xlu0.b32.cont [10/16] (narrow) %v832_v41, 8 }
 0x296   : > { %875 = vxpose.xlu0.b32.cont [11/16] (narrow) %v837_v43, 8 }
 0x29a   : > { %876 = vxpose.xlu0.b32.cont [12/16] (narrow) %v842_v45, 8 }
 0x29e   : > { %877 = vxpose.xlu0.b32.cont [13/16] (narrow) %v847_v47, 8 }
 0x2a2   : > { %878 = vxpose.xlu0.b32.cont [14/16] (narrow) %v852_v49, 8 }
 0x2a6   : > { %879 = vxpose.xlu0.b32.cont [15/16] (narrow) %v857_v51, 8 }
 0x2aa   : > { %880 = vxpose.xlu0.b32.end [16/16] (narrow) %v862_v52, 8 }
 0x2ea   : > { %v881_v53 = vpop.trf.xlu0 }
 0x2eb   : > { %897 = vst [vmem:[%s271_s29] sm:$0x1] %v881_v53 }
 0x2ec   : > { %1268 = shalt.err (!%p1265_p3)
}
 0x2ed   : > { %s1269_s21 = scalar_lea.hbm %s909_s13, 16  ;;  %s1273_s23 = scalar_lea.hbm %s1602_s7, 32 }
 0x2ee   : > { %p1270_p4 = scmp.ne.s32.totalorder %s909_s13, %s1269_s21  ;;  %p1274_p9 = scmp.lt.s32.totalorder %s909_s13, %s1602_s7 }
 0x2ef   : > { %p1275_p10 = scmp.lt.s32.totalorder %s1273_s23, %s1269_s21 }
 0x2f0   : > { %p1271_p7 = pnand %p1270_p4, %p1393_p5 }
 0x2f1   : > { %p1276_p11 = por %p1275_p10, %p1274_p9 }
 0x2f2   : > { %p1272_p8 = pneg %p1271_p7 }
 0x2f4   : > { %p1277_p12 = pnand %p1276_p11, %p1272_p8 }
 0x2f6   : > { %1280 = shalt.err (!%p1277_p12)
}
 0x2f7   : > { %1216 = dma.vmem_to_hbm [thread:$0]  (%p1393_p5), %s1556_s15, 16, %s909_s13, %s899_s14  }
 0x2f8 PF: > { %p1222_p13 = scmp.ge.s32.totalorder %s1315_s27, 2  ;;  %s923_s8 = sand.u32 1, %s1303_s24  }
 0x2f9   : > { %s924_s9 = scalar_lea.sflag [#allocation3], %s923_s8 }
 0x2fa   : > { %p1219_p0 = pnand %p1222_p13, %p1397_p6 }
 0x2fc   : > { %p1220_p1 = pneg %p1219_p0 }
 0x2fe   : > { %1298 = dma.done.wait (%p1220_p1), %s924_s9, 16  }
 0x2ff   : > { %1300 = vsyncadd (%p1220_p1), %s924_s9, 4294967280  ;;  %p17_p2 = scmp.ge.s32.totalorder %s1381_s30, 4   ;;  %s1605_s24 = smov %s1307_s25 }
 0x300   : > { %s1606_s25 = smov %s1311_s26  ;;  %s1607_s26 = smov %s1391_s10 }
 0x301   : > { %s1608_s27 = smov %s1381_s30  ;;  %19 = sbr.rel (!%p17_p2) target bundleno = 3 (0x3), region = 83 }
 0x306   :  { %928 = vsyncpa [#allocation3], 1 }
 0x307   :  { %930 = vsyncpa [#allocation3 + $0x1], 1 }

</bundles_post_ra>
